<compile_context>
chip_gen: v7x
topology: tpu7x:2x2x1
jax: 0.10.0
libtpu: 0.0.40
codegen_flags: <defaults>
</compile_context>

<pallas_src>
import functools

import jax
import jax.numpy as jnp
from jax import lax
from jax.experimental import pallas as pl
from jax.experimental.pallas import tpu as pltpu


# Leading "parallel" grid axis: sharded across TensorCores on v7x (2 TC/chip),
# a negligible 2-iteration serial loop on v5e/v6e (1 TC).
_NUM_CORE_SPLITS = 2


def _recons_loss_kernel(pred_ref, gt_ref, out_ref, acc_ref, *,
                        loss_type, start, end, n_rows, tm, inner,
                        may_be_ragged, native_low_precision):
    c = pl.program_id(0)   # core-split index ("parallel")
    j = pl.program_id(1)   # row-block index within the split ("arbitrary")

    @pl.when(j == 0)
    def _():
        acc_ref[...] = jnp.zeros_like(acc_ref)

    p = pred_ref[...]
    g = gt_ref[...]
    if native_low_precision:
        d_low = p - g                                   # bf16 VALU (v6e/v7x)
    else:
        d_low = p.astype(jnp.float32) - g.astype(jnp.float32)

    if loss_type == 'l1':                               # torch.nn.L1Loss
        e = jnp.abs(d_low).astype(jnp.float32)
    elif loss_type == 'l2':                             # torch.nn.MSELoss
        df = d_low.astype(jnp.float32)
        e = df * df
    elif loss_type == 'l1_smooth':                      # SmoothL1Loss (beta=1)
        df = d_low.astype(jnp.float32)
        ad = jnp.abs(df)
        e = jnp.where(ad < 1.0, 0.5 * df * df, ad - 0.5)
    else:
        raise ValueError(f"unknown recons_loss: {loss_type}")

    W = e.shape[1]
    lane_mask_needed = (start > 0) or (end < W)

    def accumulate(tile):
        # Sublane reduction (XLU, hidden under the DMA bottleneck) -> (1, W);
        # the lane mask is applied on the reduced row (one vreg of work).
        rowsum = jnp.sum(tile, axis=0, keepdims=True)
        if lane_mask_needed:
            lane = lax.broadcasted_iota(jnp.int32, rowsum.shape, 1)
            if start > 0:
                lmask = (lane >= start) & (lane < end)
            else:
                lmask = lane < end
            rowsum = jnp.where(lmask, rowsum, jnp.float32(0.0))
        acc_ref[...] += rowsum

    # Intended (unclamped) global row-block id for this grid point; the
    # index_map clamps the actual DMA to a valid block, and any rows at or
    # beyond n_rows are zeroed here before accumulation.
    b = c * inner + j
    blk_start = b * tm

    if may_be_ragged:
        needs_row_mask = (blk_start + tm) > n_rows

        @pl.when(needs_row_mask)
        def _():
            row = lax.broadcasted_iota(jnp.int32, e.shape, 0)
            row_ok = (blk_start + row) < n_rows
            accumulate(jnp.where(row_ok, e, jnp.float32(0.0)))

        @pl.when(jnp.logical_not(needs_row_mask))
        def _():
            accumulate(e)
    else:
        accumulate(e)

    @pl.when(j == pl.num_programs(1) - 1)
    def _():
        partial = jnp.sum(acc_ref[...])       # single cross-lane reduce / split
        out_ref[...] = jnp.full(out_ref.shape, partial, jnp.float32)


def _vmem_capacity_bytes():
    try:
        return int(pltpu.get_tpu_info().vmem_capacity_bytes)
    except Exception:
        return 64 * 1024 * 1024               # conservative (v7x-sized) default


def _choose_tm(n_rows, w, itemsize):
    """Largest row tile whose double-buffered, lane-padded footprint fits."""
    if n_rows <= 8:
        return max(1, n_rows)                 # block equal to the full row dim
    cap = _vmem_capacity_bytes()
    budget = cap // 3
    wpad = pl.cdiv(w, 128) * 128              # VMEM pads the lane dim to 128
    per_row = 2 * 2 * wpad * itemsize         # 2 inputs x 2 pipeline buffers
    tm = (budget // per_row // 8) * 8
    tm = min(tm, (n_rows // 8) * 8)           # never larger than the data
    per_split = -(-n_rows // _NUM_CORE_SPLITS)
    tm = min(tm, max(8, -(-per_split // 8) * 8))   # keep both splits busy
    return int(max(8, tm))


def _masked_mean_loss(motion_pred, motion_gt, *, start, end, loss_type):
    """Mean of elementwise loss over motion[..., start:end], via Pallas."""
    assert motion_pred.shape == motion_gt.shape
    D = motion_pred.shape[-1]
    assert 0 <= start < end <= D
    pred2 = motion_pred.reshape(-1, D)
    gt2 = motion_gt.reshape(-1, D)
    N = pred2.shape[0]

    # Narrow the DMA'd lane window when the feature slice fits entirely inside
    # the first k*128 lanes (e.g. forward_vel on 263-dim motion -> 128 lanes).
    W = D
    w_cand = pl.cdiv(end, 128) * 128
    if start < 128 and w_cand < D:
        W = w_cand

    itemsize = max(jnp.dtype(pred2.dtype).itemsize,
                   jnp.dtype(gt2.dtype).itemsize)
    tm = _choose_tm(N, W, itemsize)

    nb = pl.cdiv(N, tm)                        # row blocks overall
    inner = pl.cdiv(nb, _NUM_CORE_SPLITS)      # row blocks per core split
    may_be_ragged = (N % tm != 0) or (_NUM_CORE_SPLITS * inner != nb)

    native_lp = (pred2.dtype == jnp.bfloat16 and gt2.dtype == jnp.bfloat16)

    kernel = functools.partial(
        _recons_loss_kernel,
        loss_type=loss_type, start=start, end=end, n_rows=N, tm=tm,
        inner=inner, may_be_ragged=may_be_ragged,
        native_low_precision=native_lp)

    def row_map(c, j):
        # Clamp so the DMA'd block is always in-bounds; out-of-range grid
        # points are fully zeroed by the in-kernel row mask.
        return (jnp.minimum(c * inner + j, nb - 1), 0)

    wpad = pl.cdiv(W, 128) * 128
    footprint = (2 * 2 * tm * wpad * itemsize      # double-buffered inputs
                 + 8 * wpad * 4                    # accumulator (padded)
                 + 2 * 8 * 128 * 4)                # output blocks
    cap = _vmem_capacity_bytes()
    vmem_limit = int(min(int(cap * 0.9),
                         max(footprint + footprint // 2 + (4 << 20),
                             32 << 20)))

    out = pl.pallas_call(
        kernel,
        out_shape=jax.ShapeDtypeStruct((_NUM_CORE_SPLITS, 8, 128),
                                       jnp.float32),
        grid_spec=pltpu.PrefetchScalarGridSpec(
            num_scalar_prefetch=0,
            grid=(_NUM_CORE_SPLITS, inner),
            in_specs=[
                pl.BlockSpec((tm, W), row_map),
                pl.BlockSpec((tm, W), row_map),
            ],
            out_specs=pl.BlockSpec((1, 8, 128), lambda c, j: (c, 0, 0)),
            scratch_shapes=[pltpu.VMEM((1, W), jnp.float32)],
        ),
        compiler_params=pltpu.CompilerParams(
            dimension_semantics=("parallel", "arbitrary"),
            vmem_limit_bytes=vmem_limit),
    )(pred2, gt2)

    count = N * (end - start)
    return jnp.sum(out[:, 0, 0]) / jnp.float32(count)


class ReConsLoss:
    """JAX/Pallas port of the PyTorch ReConsLoss module (forward pass)."""

    def __init__(self, recons_loss, nb_joints):
        assert recons_loss in ('l1', 'l2', 'l1_smooth')
        self.loss_type = recons_loss
        self.nb_joints = nb_joints
        self.motion_dim = (nb_joints - 1) * 12 + 4 + 3 + 4

    def forward(self, motion_pred, motion_gt):
        return _masked_mean_loss(motion_pred, motion_gt,
                                 start=0, end=self.motion_dim,
                                 loss_type=self.loss_type)

    __call__ = forward

    def forward_vel(self, motion_pred, motion_gt):
        return _masked_mean_loss(motion_pred, motion_gt,
                                 start=4, end=(self.nb_joints - 1) * 3 + 4,
                                 loss_type=self.loss_type)

    # TODO(synk): my_forward takes a runtime boolean/integer mask over the
    # feature dim (data-dependent gather); not implemented as a Pallas kernel.


def _reference(motion_pred, motion_gt, start, end, loss_type):
    d = motion_pred[..., start:end].astype(jnp.float32) - \
        motion_gt[..., start:end].astype(jnp.float32)
    if loss_type == 'l1':
        return jnp.mean(jnp.abs(d))
    if loss_type == 'l2':
        return jnp.mean(d * d)
    ad = jnp.abs(d)
    return jnp.mean(jnp.where(ad < 1.0, 0.5 * d * d, ad - 0.5))


if __name__ == "__main__":
    key = jax.random.PRNGKey(0)
    k1, k2, k3, k4 = jax.random.split(key, 4)

    # small shapes: nb_joints=2 -> motion_dim = 1*12 + 4 + 3 + 4 = 23 <= D=32
    nb_joints = 2
    D = 32

    # case 1: rows divide the tile exactly; case 2: ragged row count
    cases = [
        (jax.random.normal(k1, (2, 8, D), dtype=jnp.float32),
         jax.random.normal(k2, (2, 8, D), dtype=jnp.float32)),
        (jax.random.normal(k3, (3, 5, D), dtype=jnp.float32),
         jax.random.normal(k4, (3, 5, D), dtype=jnp.float32)),
    ]

    ok = True
    for motion_pred, motion_gt in cases:
        for loss_name in ('l1', 'l2', 'l1_smooth'):
            mod = ReConsLoss(loss_name, nb_joints)

            out = jax.block_until_ready(mod.forward(motion_pred, motion_gt))
            ref = _reference(motion_pred, motion_gt, 0, mod.motion_dim,
                             loss_name)
            ok = ok and bool(jnp.allclose(out, ref, atol=1e-5, rtol=1e-5))

            out_v = jax.block_until_ready(
                mod.forward_vel(motion_pred, motion_gt))
            ref_v = _reference(motion_pred, motion_gt, 4,
                               (nb_joints - 1) * 3 + 4, loss_name)
            ok = ok and bool(jnp.allclose(out_v, ref_v, atol=1e-5, rtol=1e-5))

    if ok:
        print("KERNEL_OK")
    else:
        print("MISMATCH")
</pallas_src>

<mosaic_0001>
module attributes {stable_mosaic.version = 11 : i64} {
  func.func @_recons_loss_kernel(%arg0: i32, %arg1: i32, %arg2: memref<8x32xf32, #tpu.memory_space<vmem>>, %arg3: memref<8x32xf32, #tpu.memory_space<vmem>>, %arg4: memref<1x8x128xf32, #tpu.memory_space<vmem>>, %arg5: memref<1x32xf32, #tpu.memory_space<vmem>>) attributes {dimension_semantics = [#tpu.dimension_semantics<parallel>, #tpu.dimension_semantics<arbitrary>], iteration_bounds = array<i64: 2, 1>, scalar_prefetch = 0 : i64, scratch_operands = 1 : i64, tpu.core_type = #tpu.core_type<tc>, window_params = [{transform_indices = @transform_0, window_bounds = array<i64: 8, 32>}, {transform_indices = @transform_1, window_bounds = array<i64: 8, 32>}, {transform_indices = @transform_2, window_bounds = array<i64: 1, 8, 128>}]} {
    %c0_i32 = arith.constant 0 : i32
    %0 = arith.cmpi eq, %arg1, %c0_i32 : i32
    %1 = arith.extui %0 : i1 to i32
    %c0_i32_0 = arith.constant 0 : i32
    %2 = arith.cmpi ne, %1, %c0_i32_0 : i32
    scf.if %2 {
      %cst_11 = arith.constant 0.000000e+00 : f32
      %20 = vector.broadcast %cst_11 : f32 to vector<1x32xf32>
      %c0_12 = arith.constant 0 : index
      %c0_13 = arith.constant 0 : index
      %21 = vector.load %arg5[%c0_12, %c0_13] : memref<1x32xf32, #tpu.memory_space<vmem>>, vector<1x32xf32>
      tpu.vector_store %arg5[%c0_12, %c0_13], %20 {strides = array<i32>} : memref<1x32xf32, #tpu.memory_space<vmem>>, vector<1x32xf32>,
    } else {
    }
    %c0 = arith.constant 0 : index
    %c0_1 = arith.constant 0 : index
    %3 = vector.load %arg2[%c0, %c0_1] : memref<8x32xf32, #tpu.memory_space<vmem>>, vector<8x32xf32>
    %c0_2 = arith.constant 0 : index
    %c0_3 = arith.constant 0 : index
    %4 = vector.load %arg3[%c0_2, %c0_3] : memref<8x32xf32, #tpu.memory_space<vmem>>, vector<8x32xf32>
    %5 = arith.subf %3, %4 : vector<8x32xf32>
    %6 = math.absf %5 : vector<8x32xf32>
    %cst = arith.constant dense<0.000000e+00> : vector<32xf32>
    %7 = vector.multi_reduction <add>, %6, %cst [0] : vector<8x32xf32> to vector<32xf32>
    %8 = vector.shape_cast %7 : vector<32xf32> to vector<1x32xf32>
    %9 = tpu.iota {dimensions = array<i32: 1>} : vector<1x32xi32>
    %c23_i32 = arith.constant 23 : i32
    %10 = vector.broadcast %c23_i32 : i32 to vector<1x32xi32>
    %11 = arith.cmpi slt, %9, %10 : vector<1x32xi32>
    %cst_4 = arith.constant 0.000000e+00 : f32
    %12 = vector.broadcast %cst_4 : f32 to vector<1x32xf32>
    %13 = arith.select %11, %8, %12 : vector<1x32xi1>, vector<1x32xf32>
    %c0_5 = arith.constant 0 : index
    %c0_6 = arith.constant 0 : index
    %14 = vector.load %arg5[%c0_5, %c0_6] : memref<1x32xf32, #tpu.memory_space<vmem>>, vector<1x32xf32>
    %15 = arith.addf %14, %13 : vector<1x32xf32>
    %c0_7 = arith.constant 0 : index
    %c0_8 = arith.constant 0 : index
    %16 = vector.load %arg5[%c0_7, %c0_8] : memref<1x32xf32, #tpu.memory_space<vmem>>, vector<1x32xf32>
    tpu.vector_store %arg5[%c0_7, %c0_8], %15 {strides = array<i32>} : memref<1x32xf32, #tpu.memory_space<vmem>>, vector<1x32xf32>,
    %c0_i32_9 = arith.constant 0 : i32
    %17 = arith.cmpi eq, %arg1, %c0_i32_9 : i32
    %18 = arith.extui %17 : i1 to i32
    %c0_i32_10 = arith.constant 0 : i32
    %19 = arith.cmpi ne, %18, %c0_i32_10 : i32
    scf.if %19 {
      %c0_11 = arith.constant 0 : index
      %c0_12 = arith.constant 0 : index
      %20 = vector.load %arg5[%c0_11, %c0_12] : memref<1x32xf32, #tpu.memory_space<vmem>>, vector<1x32xf32>
      %21 = vector.shape_cast %20 : vector<1x32xf32> to vector<1x1x32xf32>
      %cst_13 = arith.constant dense<0.000000e+00> : vector<1xf32>
      %22 = vector.multi_reduction <add>, %21, %cst_13 [1, 2] : vector<1x1x32xf32> to vector<1xf32>
      %23 = vector.shape_cast %22 : vector<1xf32> to vector<1x1x1xf32>
      %24 = vector.extract %23[0, 0, 0] : f32 from vector<1x1x1xf32>
      %25 = vector.broadcast %24 : f32 to vector<1x8x128xf32>
      %c0_14 = arith.constant 0 : index
      %c0_15 = arith.constant 0 : index
      %c0_16 = arith.constant 0 : index
      %26 = vector.load %arg4[%c0_14, %c0_15, %c0_16] : memref<1x8x128xf32, #tpu.memory_space<vmem>>, vector<1x8x128xf32>
      tpu.vector_store %arg4[%c0_14, %c0_15, %c0_16], %25 {strides = array<i32>} : memref<1x8x128xf32, #tpu.memory_space<vmem>>, vector<1x8x128xf32>,
    } else {
    }
    return
  }
  func.func @transform_0(%arg0: i32, %arg1: i32) -> (i32, i32) {
    %c1_i32 = arith.constant 1 : i32
    %0 = arith.muli %arg0, %c1_i32 : i32
    %1 = arith.addi %0, %arg1 : i32
    %c1_i32_0 = arith.constant 1 : i32
    %2 = arith.minsi %1, %c1_i32_0 : i32
    %c0_i32 = arith.constant 0 : i32
    %c0_i32_1 = arith.constant 0 : i32
    return %2, %c0_i32 : i32, i32
  }
  func.func @transform_1(%arg0: i32, %arg1: i32) -> (i32, i32) {
    %c1_i32 = arith.constant 1 : i32
    %0 = arith.muli %arg0, %c1_i32 : i32
    %1 = arith.addi %0, %arg1 : i32
    %c1_i32_0 = arith.constant 1 : i32
    %2 = arith.minsi %1, %c1_i32_0 : i32
    %c0_i32 = arith.constant 0 : i32
    %c0_i32_1 = arith.constant 0 : i32
    return %2, %c0_i32 : i32, i32
  }
  func.func @transform_2(%arg0: i32, %arg1: i32) -> (i32, i32, i32) {
    %c0_i32 = arith.constant 0 : i32
    %c0_i32_0 = arith.constant 0 : i32
    %c0_i32_1 = arith.constant 0 : i32
    return %arg0, %c0_i32, %c0_i32_0 : i32, i32, i32
  }
}

</mosaic_0001>

<bundles_post_ra>
// kernel: tpu_custom_call.1
= control target key start
LH: loop header
LB: loop body
LE: loop exit
PB: predicated region body
PF: predicated region fallthrough
CT: control target
= control target key end

     0   :  { %7 = vsyncpa [#allocation4], 0  ;;  %s944_s0 = inlined_call_operand.hbm [shape: f32[16,32], index: 0, kind: input, shape index: {}]   ;;  %s945_s1 = inlined_call_operand.hbm [shape: f32[16,32], index: 1, kind: input, shape index: {}]   ;;  %s946_s2 = inlined_call_operand.hbm [shape: f32[2,8,128], index: 2, kind: output, shape index: {}]  }
   0x1   :  { %9 = vsyncpa [#allocation4 + $0x1], 0 }
   0x2   :  { %10 = vsyncpa [#allocation7], 0 }
   0x3   :  { %12 = vsyncpa [#allocation7 + $0x1], 0 }
   0x4   :  { %13 = vsyncpa [#allocation5], 0 }
   0x5   :  { %15 = vsyncpa [#allocation5 + $0x1], 0  ;;  %s690_s9 = smov 0   ;;  %s692_s10 = smov 0  }
   0x6   :  { %s694_s11 = smov 0   ;;  %s696_s12 = smov 0  }
   0x7   :  { %s698_s13 = smov 0   ;;  %s700_s14 = smov 0  }
   0x8   :  { %s702_s15 = smov 0   ;;  %s704_s16 = smov 0  }
   0x9   :  { %s706_s17 = smov 0  }
   0xa LB: > { %s389_s18 = sadd.s32 4294967295, %s669_s17   ;;  %s390_s19 = sadd.s32 4294967294, %s669_s17   ;;  %s669_s17 = sphi %s706_s17, %s21_s17   ;;  %s665_s16 = sphi %s704_s16, %s971_s16   ;;  %s661_s15 = sphi %s702_s15, %s970_s15   ;;  %s657_s14 = sphi %s700_s14, %s969_s14   ;;  %s653_s13 = sphi %s698_s13, %s968_s13   ;;  %s649_s12 = sphi %s696_s12, %s967_s12   ;;  %s645_s11 = sphi %s694_s11, %s966_s11   ;;  %s641_s10 = sphi %s692_s10, %s965_s10   ;;  %s637_s9 = sphi %s690_s9, %s964_s9  }
   0xb   : > { %s33_s20 = sadd.s32 1, %s665_s16  ;;  %p38_p0 = scmp.lt.s32.totalorder %s665_s16, 1 }
   0xc   : > { %p35_p1 = scmp.ge.s32.totalorder %s33_s20, 2  ;;  %s46_s21 = sadd.s32 1, %s657_s14 }
   0xd   : > { %s739_s22 = scalar_select %p38_p0, %s665_s16, 1 }
   0xe   : > { %s973_s20 = smov (%p35_p1, %s33_s20), 0  ;;  %p53_p2 = scmp.ne.s32.totalorder %s657_s14, %s653_s13 }
   0xf   : > { %p54_p3 = scmp.eq.s32.totalorder %s669_s17, 0  ;;  %p41_p4 = scmp.lt.s32.totalorder %s973_s20, 1 }
  0x10   : > { %p59_p5 = scmp.ne.s32.totalorder %s653_s13, %s649_s12  ;;  %p60_p7 = scmp.eq.s32.totalorder %s389_s18, 0 }
  0x11   : > { %p748_p6 = por %p54_p3, %p53_p2  ;;  %s101_s26 = ssub.s32 %s665_s16, %s973_s20 }
  0x12   : > { %s42_s24 = scalar_select %p41_p4, %s973_s20, 1 }
  0x13   : > { %p753_p8 = por %p60_p7, %p59_p5  ;;  %p102_p9 = scmp.eq.s32.totalorder %s101_s26, 0 }
  0x14   : > { %s43_s27 = ssub.s32 %s739_s22, %s42_s24  ;;  %s104_s28 = sadd.s32 1, %s645_s11 }
  0x15   : > { %s951_s25 = scalar_select %p753_p8, 1, 0 }
  0x16   : > { %p44_p10 = scmp.eq.s32.totalorder %s43_s27, 0  ;;  %p114_p11 = scmp.ne.s32.totalorder %s645_s11, %s641_s10 }
  0x17   : > { %s762_s29 = scalar_select %p102_p9, %s645_s11, %s104_s28  }
  0x18   : > { %s765_s30 = scalar_select %p44_p10, %s657_s14, %s46_s21  }
  0x19   : > { %p115_p12 = scmp.eq.s32.totalorder %s389_s18, 1  ;;  %p120_p13 = scmp.ne.s32.totalorder %s641_s10, %s637_s9 }
  0x1a   : > { %p121_p0 = scmp.eq.s32.totalorder %s390_s19, 1  ;;  %p424_p4 = scmp.lt.s32.totalorder %s669_s17, 2 }
  0x1b   : > { %p771_p1 = por %p115_p12, %p114_p11  ;;  %s782_s5 = sand.u32 1, %s657_s14  }
  0x1c   : > { %p776_p3 = por %p121_p0, %p120_p13  ;;  %s394_s6 = sshll.u32 %s739_s22, 7 }
  0x1d   : > { %s952_s3 = scalar_select %p771_p1, 1, 0 }
  0x1e   : > { %s953_s4 = scalar_select %p776_p3, 1, 0 }
  0x1f   : > { %s947_s7 = sshll.u32 %s782_s5, 3  ;;  %s791_s18 = scalar_lea.hbm %s944_s0, %s394_s6 }
  0x20   : > { %s145_s19 = scalar_lea.vmem [#allocation3], %s947_s7  ;;  %p797_p5 = pnand %p424_p4, %p748_p6 }
  0x21   : > { %s155_s21 = sshll.u32 %s145_s19, 4  ;;  %s142_s26 = scalar_lea.sflag [#allocation4], %s782_s5  ;;  %s801_s21 = int_to_ptr.vmem [resolvable:$true] %s155_s21 }
  0x22   : > { %s499_s27 = scalar_lea.hbm %s791_s18, 128  ;;  %p501_p11 = pneg %p797_p5 }
  0x23   : > { %p500_p10 = scmp.ne.s32.totalorder %s791_s18, %s499_s27  ;;  %s504_s8 = scalar_lea.hbm %s944_s0, 256 }
  0x24   : > { %p505_p6 = scmp.lt.u32.totalorder %s791_s18, %s944_s0  ;;  %p506_p0 = scmp.lt.u32.totalorder %s504_s8, %s499_s27 }
  0x25   : > { %p502_p12 = pnand %p501_p11, %p500_p10  ;;  %p508_p2 = scmp.lt.u32.totalorder %s499_s27, %s791_s18 }
  0x26   : > { %p507_p4 = por %p506_p0, %p505_p6 }
  0x27   : > { %p503_p13 = pneg %p502_p12 }
  0x28   : > { %p509_p7 = por %p508_p2, %p507_p4 }
  0x2a   : > { %p510_p9 = pnand %p509_p7, %p503_p13 }
  0x2c   : > { %513 = shalt.err (!%p510_p9)
}
  0x2d   : > { %s514_s7 = scalar_lea.vmem %s801_s21, 128  ;;  %s671_s23 = smov [#allocation3]  }
  0x2e   : > { %p515_p10 = scmp.ne.s32.totalorder %s801_s21, %s514_s7  ;;  %s519_s28 = sshll.u32 %s671_s23, 4  ;;  %s520_s28 = int_to_ptr.vmem [resolvable:$false] %s519_s28 }
  0x2f   : > { %s521_s12 = scalar_lea.vmem %s520_s28, 256  ;;  %p522_p1 = scmp.lt.s32.totalorder %s801_s21, %s520_s28 }
  0x30   : > { %p517_p12 = pnand %p515_p10, %p501_p11  ;;  %p523_p6 = scmp.lt.s32.totalorder %s521_s12, %s514_s7 }
  0x32   : > { %p518_p3 = pneg %p517_p12  ;;  %p524_p0 = por %p523_p6, %p522_p1 }
  0x34   : > { %p525_p2 = pnand %p524_p0, %p518_p3 }
  0x36   : > { %528 = shalt.err (!%p525_p2)
}
  0x37   : > { %416 = dma.hbm_to_vmem [thread:$0]  (!%p797_p5), %s791_s18, 128, %s801_s21, %s142_s26  }
  0x38   : > { %p955_p7 = scmp.lt.s32.totalorder %s669_s17, 3  ;;  %p956_p9 = scmp.ge.s32.totalorder %s669_s17, 1 }
  0x39   : > { %s844_s19 = scalar_lea.hbm %s945_s1, %s394_s6  ;;  %s958_s23 = sshll.u32 %s782_s5, 3 }
  0x3a   : > { %p835_p13 = pnand %p956_p9, %p955_p7  ;;  %s166_s28 = scalar_lea.vmem [#allocation6], %s958_s23 }
  0x3b   : > { %s176_s12 = sshll.u32 %s166_s28, 4  ;;  %s163_s18 = scalar_lea.sflag [#allocation7], %s782_s5  ;;  %s177_s12 = int_to_ptr.vmem [resolvable:$true] %s176_s12 }
  0x3c   : > { %s957_s27 = scalar_select %p835_p13, 1, 0 }
  0x3d   : > { %s529_s21 = scalar_lea.hbm %s844_s19, 128  ;;  %s534_s6 = scalar_lea.hbm %s945_s1, 256 }
  0x3e   : > { %p530_p1 = scmp.ne.s32.totalorder %s844_s19, %s529_s21  ;;  %p535_p10 = scmp.lt.u32.totalorder %s844_s19, %s945_s1 }
  0x3f   : > { %p536_p12 = scmp.lt.u32.totalorder %s534_s6, %s529_s21  ;;  %p538_p0 = scmp.lt.u32.totalorder %s529_s21, %s844_s19 }
  0x40   : > { %p532_p3 = pnand %p530_p1, %p501_p11 }
  0x41   : > { %p537_p6 = por %p536_p12, %p535_p10 }
  0x42   : > { %p533_p4 = pneg %p532_p3 }
  0x43   : > { %p539_p2 = por %p538_p0, %p537_p6 }
  0x45   : > { %p540_p7 = pnand %p539_p2, %p533_p4 }
  0x47   : > { %543 = shalt.err (!%p540_p7)
}
  0x48   : > { %s544_s5 = scalar_lea.vmem %s177_s12, 128  ;;  %s672_s23 = smov [#allocation6]  }
  0x49   : > { %p545_p9 = scmp.ne.s32.totalorder %s177_s12, %s544_s5  ;;  %s549_s28 = sshll.u32 %s672_s23, 4  ;;  %s550_s28 = int_to_ptr.vmem [resolvable:$false] %s549_s28 }
  0x4a   : > { %s551_s22 = scalar_lea.vmem %s550_s28, 256  ;;  %p552_p8 = scmp.lt.s32.totalorder %s177_s12, %s550_s28 }
  0x4b   : > { %p547_p1 = pnand %p545_p9, %p501_p11  ;;  %p553_p13 = scmp.lt.s32.totalorder %s551_s22, %s544_s5 }
  0x4d   : > { %p548_p3 = pneg %p547_p1  ;;  %p554_p10 = por %p553_p13, %p552_p8 }
  0x4f   : > { %p555_p12 = pnand %p554_p10, %p548_p3 }
  0x51   : > { %558 = shalt.err (!%p555_p12)
}
  0x52   : > { %419 = dma.hbm_to_vmem [thread:$0]  (!%p797_p5), %s844_s19, 128, %s177_s12, %s163_s18  }
  0x53   : > { %p959_p4 = scmp.ne.s32.totalorder %s957_s27, 0 }
  0x54   : > { %s187_s21 = sand.u32 (!%p959_p4), 1, %s653_s13   ;;  %p960_p11 = scmp.ne.s32.totalorder (!%p959_p4), %s951_s25, 0 }
  0x55   : > { %185 = sbr.rel (%p959_p4) target bundleno = 344 (0x158), region = 28  ;;  %s398_s26 = sshll.u32 (!%p959_p4), %s187_s21, 3 }
  0x56   : > { %s188_s6 = scalar_lea.sflag (!%p959_p4), [#allocation4], %s187_s21  ;;  %s191_s7 = scalar_lea.vmem (!%p959_p4), [#allocation3], %s398_s26 }
  0x5c   : > { %624 = dma.done.wait (%p960_p11), %s188_s6, 128  }
  0x5d   : > { %626 = vsyncadd (%p960_p11), %s188_s6, 4294967168  ;;  %s197_s8 = scalar_lea.sflag [#allocation7], %s187_s21  ;;  %s200_s5 = scalar_lea.vmem [#allocation6], %s398_s26 }
  0x5e   : > { %628 = dma.done.wait (%p960_p11), %s197_s8, 128  }
  0x5f   : > { %630 = vsyncadd (%p960_p11), %s197_s8, 4294967168  ;;  %vm236_vm0 = vcmask 253952   ;;  %v673_v0 = vmov 0.0   ;;  %v238_v1 = vld [vmem:[%s191_s7] sm:$0xff]  ;;  %v239_v2 = vld [vmem:[%s200_s5] sm:$0xff]  ;;  %vm242_vm1 = vcmask 261120   ;;  %v250_v7 = vlaneseq }
  0x60   : > { %237 = vst.msk [vmem:[#allocation2] sm:$0x1] %vm236_vm0, %v673_v0  ;;  %v240_v3 = vsub.f32 %v238_v1, %v239_v2  ;;  %s223_s25 = sand.u32 1, %s641_s10   ;;  %s402_s12 = sshll.u32 %s661_s15, 7 }
  0x61   : > { %v251_v10 = vand.u32 127, %v250_v7  ;;  %s400_s24 = sshll.u32 %s223_s25, 3  ;;  %s889_s22 = scalar_lea.hbm %s946_s2, %s402_s12 }
  0x62   : > { %v241_v4 = vand.u32 2147483647, %v240_v3  ;;  %s225_s27 = scalar_lea.vmem [#allocation8], %s400_s24  ;;  %s275_s21 = scalar_lea.sflag [#allocation5], %s223_s25 }
  0x63   : > { %vm252_vm2 = vcmp.lt.s32.totalorder %v251_v10, 23  ;;  %s288_s19 = sshll.u32 %s225_s27, 4  ;;  %p961_p5 = scmp.ne.s32.totalorder %s952_s3, 0  ;;  %s884_s19 = int_to_ptr.vmem [resolvable:$true] %s288_s19 }
  0x64   : > { %v243_v5 = vsel %vm242_vm1, %v241_v4, 0.0  ;;  %s559_s26 = scalar_lea.vmem %s884_s19, 128  ;;  %s674_s15 = smov [#allocation8]  }
  0x65   : > { %v244_v6 = vrot.slane %v243_v5, 4  ;;  %p560_p8 = scmp.ne.s32.totalorder %s884_s19, %s559_s26  ;;  %s563_s6 = sshll.u32 %s674_s15, 4  ;;  %s564_s6 = int_to_ptr.vmem [resolvable:$false] %s563_s6 }
  0x66   : > { %s565_s7 = scalar_lea.vmem %s564_s6, 256  ;;  %p566_p0 = scmp.lt.s32.totalorder %s884_s19, %s564_s6 }
  0x67   : > { %v245_v8 = vadd.f32 %v244_v6, %v243_v5  ;;  %v254_v14 = vld [vmem:[#allocation2] sm:$0x1]  ;;  %p561_p13 = pnand %p560_p8, %p961_p5  ;;  %p567_p2 = scmp.lt.s32.totalorder %s565_s7, %s559_s26 }
  0x69   : > { %v246_v9 = vrot.slane %v245_v8, 2  ;;  %p562_p6 = pneg %p561_p13  ;;  %p568_p7 = por %p567_p2, %p566_p0 }
  0x6b   : > { %v247_v11 = vadd.f32 %v246_v9, %v245_v8  ;;  %p569_p9 = pnand %p568_p7, %p562_p6 }
  0x6d   : > { %v248_v12 = vrot.slane %v247_v11, 1 }
  0x6f   : > { %v249_v13 = vadd.f32 %v248_v12, %v247_v11 }
  0x71   : > { %v253_v15 = vsel %vm252_vm2, %v249_v13, 0.0 }
  0x72   : > { %v255_v16 = vadd.f32 %v254_v14, %v253_v15 }
  0x74   : > { %257 = vst.msk [vmem:[#allocation2] sm:$0x1] %vm236_vm0, %v255_v16 }
  0x7b   : > { %v261_v17 = vld [vmem:[#allocation2] sm:$0x1] }
  0x7c   : > { %v262_v18 = vsel %vm236_vm0, %v261_v17, 0.0 }
  0x7d   : > { %263 = vadd.xlane.f32.xlu0 %v262_v18 }
 0x10a   : > { %v264_v19 = vpop.xlane.xlu0 %263 }
 0x10b   : > { %v265_v20 = vrot.slane %v264_v19, 4 }
 0x10d   : > { %v266_v21 = vadd.f32 %v265_v20, %v264_v19 }
 0x10f   : > { %v267_v22 = vrot.slane %v266_v21, 2 }
 0x111   : > { %v268_v23 = vadd.f32 %v267_v22, %v266_v21 }
 0x113   : > { %v269_v24 = vrot.slane %v268_v23, 1 }
 0x115   : > { %v270_v25 = vadd.f32 %v269_v24, %v268_v23 }
 0x117   : > { %405 = vpush %v270_v25 }
 0x148   : > { %s406_s18 = spop %405 }
 0x149   : > { %v272_v26 = vstv %s406_s18 }
 0x14a   : > { %273 = vst [vmem:[%s225_s27] sm:$0xff] %v272_v26 }
 0x14b   : > { %572 = shalt.err (!%p569_p9)
}
 0x14c   : > { %s573_s8 = scalar_lea.hbm %s889_s22, 128  ;;  %s577_s24 = scalar_lea.hbm %s946_s2, 256 }
 0x14d   : > { %p574_p1 = scmp.ne.s32.totalorder %s889_s22, %s573_s8  ;;  %p578_p12 = scmp.lt.u32.totalorder %s889_s22, %s946_s2 }
 0x14e   : > { %p579_p4 = scmp.lt.u32.totalorder %s577_s24, %s573_s8  ;;  %p581_p8 = scmp.lt.u32.totalorder %s573_s8, %s889_s22 }
 0x14f   : > { %p575_p3 = pnand %p574_p1, %p961_p5 }
 0x150   : > { %p580_p11 = por %p579_p4, %p578_p12 }
 0x151   : > { %p576_p10 = pneg %p575_p3 }
 0x152   : > { %p582_p13 = por %p581_p8, %p580_p11 }
 0x154   : > { %p583_p6 = pnand %p582_p13, %p576_p10 }
 0x156   : > { %586 = shalt.err (!%p583_p6)
}
 0x157   : > { %411 = dma.vmem_to_hbm [thread:$0]  (%p961_p5), %s884_s19, 128, %s889_s22, %s275_s21  }
 0x158 PF: > { %s300_s18 = sand.u32 1, %s637_s9   ;;  %p962_p0 = scmp.ne.s32.totalorder %s953_s4, 0 }
 0x159   : > { %p963_p2 = scmp.ge.s32.totalorder %s669_s17, 2  ;;  %s301_s23 = scalar_lea.sflag [#allocation5], %s300_s18 }
 0x15b   : > { %p421_p7 = pnand %p963_p2, %p962_p0 }
 0x15d   : > { %632 = dma.done.wait (!%p421_p7), %s301_s23, 128  }
 0x15e   : > { %634 = vsyncadd (!%p421_p7), %s301_s23, 4294967168  ;;  %s21_s17 = sadd.s32 1, %s669_s17   ;;  %s964_s9 = smov %s641_s10 }
 0x15f   : > { %p18_p9 = scmp.ge.s32.totalorder %s21_s17, 4   ;;  %s965_s10 = smov %s645_s11 }
 0x160   : > { %s966_s11 = smov %s762_s29  ;;  %s967_s12 = smov %s653_s13 }
 0x161   : > { %s968_s13 = smov %s657_s14  ;;  %s969_s14 = smov %s765_s30 }
 0x162   : > { %s970_s15 = smov %s665_s16  ;;  %s971_s16 = smov %s973_s20 }
 0x163   :  { %20 = sbr.rel (!%p18_p9) target bundleno = 10 (0xa), region = 94 }
 0x16a   :  { %306 = vsyncpa [#allocation4], 1 }
 0x16b   :  { %308 = vsyncpa [#allocation4 + $0x1], 1 }
 0x16c   :  { %309 = vsyncpa [#allocation7], 1 }
 0x16d   :  { %311 = vsyncpa [#allocation7 + $0x1], 1 }
 0x16e   :  { %312 = vsyncpa [#allocation5], 1 }
 0x16f   :  { %314 = vsyncpa [#allocation5 + $0x1], 1 }

</bundles_post_ra>
